<compile_context>
chip_gen: v6e
topology: v6e:2x2x1
jax: 0.10.0
libtpu: 0.0.40
codegen_flags: <defaults>
</compile_context>

<pallas_src>
import jax
import jax.numpy as jnp
import numpy as np
from jax.experimental import pallas as pl
from jax.experimental.pallas import tpu as pltpu

_EPS = 1e-8
_NEG_INF = -1e30


# ----------------------------- Pallas kernel -------------------------------

def _similarity_kernel(uidx_ref, iidx_ref, row_tid_ref, col_tid_ref,
                       utab_ref, itab_ref, out_ref):
    f32 = jnp.float32
    highest = jax.lax.Precision.HIGHEST

    n_rows = uidx_ref.shape[0]            # T*(B+S) stacked gather rows
    tq = row_tid_ref.shape[0]             # T*B  (query rows)
    ts = col_tid_ref.shape[1]             # T*S  (support rows)
    nu, _ = utab_ref.shape
    ni, _ = itab_ref.shape

    # ---- fused, vectorized embedding gathers: one-hot @ table on the MXU ----
    u_onehot = (jax.lax.broadcasted_iota(jnp.int32, (n_rows, nu), 1)
                == uidx_ref[...]).astype(f32)                       # (T*(B+S), NU)
    i_onehot = (jax.lax.broadcasted_iota(jnp.int32, (n_rows, ni), 1)
                == iidx_ref[...]).astype(f32)                       # (T*(B+S), NI)
    u_rows = jax.lax.dot_general(u_onehot, utab_ref[...], (((1,), (0,)), ((), ())),
                                 precision=highest, preferred_element_type=f32)
    i_rows = jax.lax.dot_general(i_onehot, itab_ref[...], (((1,), (0,)), ((), ())),
                                 precision=highest, preferred_element_type=f32)
    qu = u_rows[:tq, :]     # (T*B, D) stacked query-user embeddings
    su = u_rows[tq:, :]     # (T*S, D) stacked support-user embeddings
    qi = i_rows[:tq, :]     # (T*B, D) stacked query-item embeddings
    si = i_rows[tq:, :]     # (T*S, D) stacked support-item embeddings

    # ---- pairwise cosine logits, all tasks at once (block-diagonal mask) ----
    qu_n = qu / jnp.maximum(jnp.sqrt(jnp.sum(qu * qu, axis=-1, keepdims=True)), _EPS)
    su_n = su / jnp.maximum(jnp.sqrt(jnp.sum(su * su, axis=-1, keepdims=True)), _EPS)
    logits = jax.lax.dot_general(qu_n, su_n, (((1,), (1,)), ((), ())),
                                 precision=highest,
                                 preferred_element_type=f32)        # (T*B, T*S)
    same_task = row_tid_ref[...] == col_tid_ref[...]                # block-diag mask
    logits = jnp.where(same_task, logits, _NEG_INF)

    # ---- softmax over each task's own support set ----------------------------
    m = jnp.max(logits, axis=-1, keepdims=True)
    e = jnp.exp(logits - m)                      # masked columns underflow to 0
    attn = e / jnp.sum(e, axis=-1, keepdims=True)                    # (T*B, T*S)

    # ---- attention-weighted support item embeddings (MXU) --------------------
    agg = jax.lax.dot_general(attn, si, (((1,), (0,)), ((), ())),
                              precision=highest,
                              preferred_element_type=f32)            # (T*B, D)

    # ---- cosine(query item, aggregated item); one lane-dense store -----------
    num = jnp.sum(qi * agg, axis=-1)                                 # (T*B,)
    den = jnp.sqrt(jnp.sum(qi * qi, axis=-1)) * jnp.sqrt(jnp.sum(agg * agg, axis=-1))
    out_ref[0, :] = num / jnp.maximum(den, _EPS)


# ------------------------------ Host wrapper ---------------------------------

def _similarity_scores_impl(user_table, item_table, qu_idx, qi_idx, su_idx, si_idx):
    """Batched scoring.  qu_idx/qi_idx: (T, B) int32, su_idx/si_idx: (T, S) int32.
    Returns (T, B) float32 scores; one pallas_call (single grid step) covers
    all T tasks."""
    T, B = qu_idx.shape
    S = su_idx.shape[1]
    TQ, TS = T * B, T * S

    # Stack all user-table / item-table lookups for one one-hot gather each.
    uidx = jnp.concatenate([qu_idx.reshape(-1), su_idx.reshape(-1)]
                           ).astype(jnp.int32).reshape(TQ + TS, 1)
    iidx = jnp.concatenate([qi_idx.reshape(-1), si_idx.reshape(-1)]
                           ).astype(jnp.int32).reshape(TQ + TS, 1)
    # Task-id columns/rows for the block-diagonal attention mask (no in-kernel
    # integer division needed).
    row_tid = (jnp.arange(TQ, dtype=jnp.int32) // B).reshape(TQ, 1)
    col_tid = (jnp.arange(TS, dtype=jnp.int32) // S).reshape(1, TS)

    vmem_spec = pl.BlockSpec(memory_space=pltpu.MemorySpace.VMEM)
    out = pl.pallas_call(
        _similarity_kernel,
        out_shape=jax.ShapeDtypeStruct((1, TQ), jnp.float32),   # single lane-dense row
        in_specs=[vmem_spec] * 6,
        out_specs=vmem_spec,
        compiler_params=pltpu.CompilerParams(vmem_limit_bytes=32 * 1024 * 1024),
    )(uidx, iidx, row_tid, col_tid,
      user_table.astype(jnp.float32), item_table.astype(jnp.float32))
    return out.reshape(T, B)


similarity_scores = jax.jit(_similarity_scores_impl)


# ------------------------------ Module wrapper --------------------------------

class SimilarityLearnerPallas:
    """JAX/Pallas port of SimilarityLearner."""

    def __init__(self, user_neighbors, item_neighbors, useritem_embeds):
        # user_neighbors / item_neighbors are unused by forward(); kept for parity.
        self.user_neighbors = user_neighbors
        self.item_neighbors = item_neighbors
        # useritem_embeds = (user embedding table (NU, D), item embedding table (NI, D))
        self.user_embeds, self.item_embeds = useritem_embeds

    def forward(self, query_users, query_items, support_users, support_items):
        """Single task, matching the PyTorch signature: returns (batch_size,)."""
        qu = jnp.asarray(query_users, jnp.int32).reshape(1, -1)
        qi = jnp.asarray(query_items, jnp.int32).reshape(1, -1)
        su = jnp.asarray(support_users, jnp.int32).reshape(1, -1)
        si = jnp.asarray(support_items, jnp.int32).reshape(1, -1)
        return similarity_scores(self.user_embeds, self.item_embeds, qu, qi, su, si)[0]

    __call__ = forward

    def forward_batched(self, query_users, query_items, support_users, support_items):
        """(T,B),(T,B),(T,S),(T,S) -> (T,B): many tasks in one pallas_call."""
        return similarity_scores(
            self.user_embeds, self.item_embeds,
            jnp.asarray(query_users, jnp.int32), jnp.asarray(query_items, jnp.int32),
            jnp.asarray(support_users, jnp.int32), jnp.asarray(support_items, jnp.int32))


# ------------------------------ Reference (host) ------------------------------

def _reference(user_table, item_table, qu_idx, qi_idx, su_idx, si_idx):
    """NumPy float64 reference, same formulas as the kernel."""
    U = np.asarray(user_table, dtype=np.float64)
    I = np.asarray(item_table, dtype=np.float64)
    qu_idx, qi_idx = np.asarray(qu_idx), np.asarray(qi_idx)
    su_idx, si_idx = np.asarray(su_idx), np.asarray(si_idx)
    T, B = qu_idx.shape
    out = np.zeros((T, B), dtype=np.float64)
    eps = _EPS
    for t in range(T):
        qu, qi = U[qu_idx[t]], I[qi_idx[t]]
        su, si = U[su_idx[t]], I[si_idx[t]]
        qu_n = qu / np.maximum(np.sqrt((qu * qu).sum(-1, keepdims=True)), eps)
        su_n = su / np.maximum(np.sqrt((su * su).sum(-1, keepdims=True)), eps)
        logits = qu_n @ su_n.T
        e = np.exp(logits - logits.max(-1, keepdims=True))
        attn = e / e.sum(-1, keepdims=True)
        agg = attn @ si
        num = (qi * agg).sum(-1)
        den = np.sqrt((qi * qi).sum(-1)) * np.sqrt((agg * agg).sum(-1))
        out[t] = num / np.maximum(den, eps)
    return out


# -------------------------------- Driver ---------------------------------------

if __name__ == "__main__":
    num_users, num_items, emb_dim = 16, 32, 32
    B, S, T = 8, 8, 4            # batch_size, few_size, tasks-per-call

    keys = jax.random.split(jax.random.PRNGKey(0), 10)
    user_table = jax.random.normal(keys[0], (num_users, emb_dim), dtype=jnp.float32) * 0.1
    item_table = jax.random.normal(keys[1], (num_items, emb_dim), dtype=jnp.float32) * 0.1

    model = SimilarityLearnerPallas(user_neighbors=None, item_neighbors=None,
                                    useritem_embeds=(user_table, item_table))

    # ---- single-task forward (matches PyTorch module semantics) ----
    query_users = jax.random.randint(keys[2], (B,), 0, num_users, dtype=jnp.int32)
    query_items = jax.random.randint(keys[3], (B,), 0, num_items, dtype=jnp.int32)
    support_users = jax.random.randint(keys[4], (S,), 0, num_users, dtype=jnp.int32)
    support_items = jax.random.randint(keys[5], (S,), 0, num_items, dtype=jnp.int32)

    out1 = jax.block_until_ready(
        model.forward(query_users, query_items, support_users, support_items))
    ref1 = _reference(user_table, item_table,
                      np.asarray(query_users)[None], np.asarray(query_items)[None],
                      np.asarray(support_users)[None], np.asarray(support_items)[None])[0]
    assert out1.shape == (B,)
    assert np.allclose(np.asarray(out1, np.float64), ref1, atol=1e-4, rtol=1e-4)

    # ---- batched: T tasks in one pallas_call, single grid step ----
    qu_b = jax.random.randint(keys[6], (T, B), 0, num_users, dtype=jnp.int32)
    qi_b = jax.random.randint(keys[7], (T, B), 0, num_items, dtype=jnp.int32)
    su_b = jax.random.randint(keys[8], (T, S), 0, num_users, dtype=jnp.int32)
    si_b = jax.random.randint(keys[9], (T, S), 0, num_items, dtype=jnp.int32)

    out_b = jax.block_until_ready(model.forward_batched(qu_b, qi_b, su_b, si_b))
    ref_b = _reference(user_table, item_table, qu_b, qi_b, su_b, si_b)
    assert out_b.shape == (T, B)
    assert np.allclose(np.asarray(out_b, np.float64), ref_b, atol=1e-4, rtol=1e-4)

    print("KERNEL_OK")
</pallas_src>

<mosaic_0001>
module attributes {stable_mosaic.version = 11 : i64} {
  func.func @_similarity_kernel(%arg0: memref<16x1xi32, #tpu.memory_space<vmem>>, %arg1: memref<16x1xi32, #tpu.memory_space<vmem>>, %arg2: memref<8x1xi32, #tpu.memory_space<vmem>>, %arg3: memref<1x8xi32, #tpu.memory_space<vmem>>, %arg4: memref<16x32xf32, #tpu.memory_space<vmem>>, %arg5: memref<32x32xf32, #tpu.memory_space<vmem>>, %arg6: memref<1x8xf32, #tpu.memory_space<vmem>>) attributes {dimension_semantics = [], scalar_prefetch = 0 : i64, scratch_operands = 0 : i64, tpu.core_type = #tpu.core_type<tc>} {
    %0 = tpu.iota {dimensions = array<i32: 1>} : vector<16x16xi32>
    %c0 = arith.constant 0 : index
    %c0_0 = arith.constant 0 : index
    %1 = vector.load %arg0[%c0, %c0_0] : memref<16x1xi32, #tpu.memory_space<vmem>>, vector<16x1xi32>
    %2 = vector.broadcast %1 : vector<16x1xi32> to vector<16x16xi32>
    %3 = arith.cmpi eq, %0, %2 : vector<16x16xi32>
    %4 = arith.extui %3 : vector<16x16xi1> to vector<16x16xi32>
    %5 = arith.sitofp %4 : vector<16x16xi32> to vector<16x16xf32>
    %6 = tpu.iota {dimensions = array<i32: 1>} : vector<16x32xi32>
    %c0_1 = arith.constant 0 : index
    %c0_2 = arith.constant 0 : index
    %7 = vector.load %arg1[%c0_1, %c0_2] : memref<16x1xi32, #tpu.memory_space<vmem>>, vector<16x1xi32>
    %8 = vector.broadcast %7 : vector<16x1xi32> to vector<16x32xi32>
    %9 = arith.cmpi eq, %6, %8 : vector<16x32xi32>
    %10 = arith.extui %9 : vector<16x32xi1> to vector<16x32xi32>
    %11 = arith.sitofp %10 : vector<16x32xi32> to vector<16x32xf32>
    %c0_3 = arith.constant 0 : index
    %c0_4 = arith.constant 0 : index
    %12 = vector.load %arg4[%c0_3, %c0_4] : memref<16x32xf32, #tpu.memory_space<vmem>>, vector<16x32xf32>
    %cst = arith.constant dense<0.000000e+00> : vector<16x32xf32>
    %13 = tpu.matmul %5, %12, %cst {dimension_numbers = #tpu.dot_dimension_numbers<[1], [0], [0], [1], [0, 0, 1, 1], [], []>, precision = #tpu.contract_precision<fp32>} : vector<16x16xf32>, vector<16x32xf32>, vector<16x32xf32> -> vector<16x32xf32>
    %c0_5 = arith.constant 0 : index
    %c0_6 = arith.constant 0 : index
    %14 = vector.load %arg5[%c0_5, %c0_6] : memref<32x32xf32, #tpu.memory_space<vmem>>, vector<32x32xf32>
    %cst_7 = arith.constant dense<0.000000e+00> : vector<16x32xf32>
    %15 = tpu.matmul %11, %14, %cst_7 {dimension_numbers = #tpu.dot_dimension_numbers<[1], [0], [0], [1], [0, 0, 1, 1], [], []>, precision = #tpu.contract_precision<fp32>} : vector<16x32xf32>, vector<32x32xf32>, vector<16x32xf32> -> vector<16x32xf32>
    %16 = vector.extract_strided_slice %13 {offsets = [0, 0], sizes = [8, 32], strides = [1, 1]} : vector<16x32xf32> to vector<8x32xf32>
    %17 = vector.extract_strided_slice %13 {offsets = [8, 0], sizes = [8, 32], strides = [1, 1]} : vector<16x32xf32> to vector<8x32xf32>
    %18 = vector.extract_strided_slice %15 {offsets = [0, 0], sizes = [8, 32], strides = [1, 1]} : vector<16x32xf32> to vector<8x32xf32>
    %19 = vector.extract_strided_slice %15 {offsets = [8, 0], sizes = [8, 32], strides = [1, 1]} : vector<16x32xf32> to vector<8x32xf32>
    %20 = arith.mulf %16, %16 : vector<8x32xf32>
    %cst_8 = arith.constant dense<0.000000e+00> : vector<8xf32>
    %21 = vector.multi_reduction <add>, %20, %cst_8 [1] : vector<8x32xf32> to vector<8xf32>
    %22 = vector.shape_cast %21 : vector<8xf32> to vector<8x1xf32>
    %23 = math.sqrt %22 : vector<8x1xf32>
    %cst_9 = arith.constant 9.99999993E-9 : f32
    %24 = vector.broadcast %cst_9 : f32 to vector<8x1xf32>
    %25 = arith.maximumf %23, %24 : vector<8x1xf32>
    %26 = vector.broadcast %25 : vector<8x1xf32> to vector<8x32xf32>
    %27 = arith.divf %16, %26 : vector<8x32xf32>
    %28 = arith.mulf %17, %17 : vector<8x32xf32>
    %cst_10 = arith.constant dense<0.000000e+00> : vector<8xf32>
    %29 = vector.multi_reduction <add>, %28, %cst_10 [1] : vector<8x32xf32> to vector<8xf32>
    %30 = vector.shape_cast %29 : vector<8xf32> to vector<8x1xf32>
    %31 = math.sqrt %30 : vector<8x1xf32>
    %cst_11 = arith.constant 9.99999993E-9 : f32
    %32 = vector.broadcast %cst_11 : f32 to vector<8x1xf32>
    %33 = arith.maximumf %31, %32 : vector<8x1xf32>
    %34 = vector.broadcast %33 : vector<8x1xf32> to vector<8x32xf32>
    %35 = arith.divf %17, %34 : vector<8x32xf32>
    %cst_12 = arith.constant dense<0.000000e+00> : vector<8x8xf32>
    %36 = tpu.matmul %27, %35, %cst_12 {dimension_numbers = #tpu.dot_dimension_numbers<[1], [1], [0], [0], [0, 0, 1, 0], [], []>, precision = #tpu.contract_precision<fp32>} : vector<8x32xf32>, vector<8x32xf32>, vector<8x8xf32> -> vector<8x8xf32>
    %c0_13 = arith.constant 0 : index
    %c0_14 = arith.constant 0 : index
    %37 = vector.load %arg2[%c0_13, %c0_14] : memref<8x1xi32, #tpu.memory_space<vmem>>, vector<8x1xi32>
    %c0_15 = arith.constant 0 : index
    %c0_16 = arith.constant 0 : index
    %38 = vector.load %arg3[%c0_15, %c0_16] : memref<1x8xi32, #tpu.memory_space<vmem>>, vector<1x8xi32>
    %39 = vector.broadcast %37 : vector<8x1xi32> to vector<8x8xi32>
    %40 = vector.broadcast %38 : vector<1x8xi32> to vector<8x8xi32>
    %41 = arith.cmpi eq, %39, %40 : vector<8x8xi32>
    %cst_17 = arith.constant -1.000000e+30 : f32
    %42 = vector.broadcast %cst_17 : f32 to vector<8x8xf32>
    %43 = arith.select %41, %36, %42 : vector<8x8xi1>, vector<8x8xf32>
    %cst_18 = arith.constant dense<0xFF800000> : vector<8xf32>
    %44 = vector.multi_reduction <maximumf>, %43, %cst_18 [1] : vector<8x8xf32> to vector<8xf32>
    %45 = vector.shape_cast %44 : vector<8xf32> to vector<8x1xf32>
    %46 = vector.broadcast %45 : vector<8x1xf32> to vector<8x8xf32>
    %47 = arith.subf %43, %46 : vector<8x8xf32>
    %48 = math.exp %47 : vector<8x8xf32>
    %cst_19 = arith.constant dense<0.000000e+00> : vector<8xf32>
    %49 = vector.multi_reduction <add>, %48, %cst_19 [1] : vector<8x8xf32> to vector<8xf32>
    %50 = vector.shape_cast %49 : vector<8xf32> to vector<8x1xf32>
    %51 = vector.broadcast %50 : vector<8x1xf32> to vector<8x8xf32>
    %52 = arith.divf %48, %51 : vector<8x8xf32>
    %cst_20 = arith.constant dense<0.000000e+00> : vector<8x32xf32>
    %53 = tpu.matmul %52, %19, %cst_20 {dimension_numbers = #tpu.dot_dimension_numbers<[1], [0], [0], [1], [0, 0, 1, 1], [], []>, precision = #tpu.contract_precision<fp32>} : vector<8x8xf32>, vector<8x32xf32>, vector<8x32xf32> -> vector<8x32xf32>
    %54 = arith.mulf %18, %53 : vector<8x32xf32>
    %cst_21 = arith.constant dense<0.000000e+00> : vector<8xf32>
    %55 = vector.multi_reduction <add>, %54, %cst_21 [1] : vector<8x32xf32> to vector<8xf32>
    %56 = arith.mulf %18, %18 : vector<8x32xf32>
    %cst_22 = arith.constant dense<0.000000e+00> : vector<8xf32>
    %57 = vector.multi_reduction <add>, %56, %cst_22 [1] : vector<8x32xf32> to vector<8xf32>
    %58 = math.sqrt %57 : vector<8xf32>
    %59 = arith.mulf %53, %53 : vector<8x32xf32>
    %cst_23 = arith.constant dense<0.000000e+00> : vector<8xf32>
    %60 = vector.multi_reduction <add>, %59, %cst_23 [1] : vector<8x32xf32> to vector<8xf32>
    %61 = math.sqrt %60 : vector<8xf32>
    %62 = arith.mulf %58, %61 : vector<8xf32>
    %cst_24 = arith.constant 9.99999993E-9 : f32
    %63 = vector.broadcast %cst_24 : f32 to vector<8xf32>
    %64 = arith.maximumf %62, %63 : vector<8xf32>
    %65 = arith.divf %55, %64 : vector<8xf32>
    %c0_25 = arith.constant 0 : index
    %c0_26 = arith.constant 0 : index
    %66 = vector.load %arg6[%c0_25, %c0_26] : memref<1x8xf32, #tpu.memory_space<vmem>>, vector<1x8xf32>
    %67 = vector.shape_cast %66 : vector<1x8xf32> to vector<8xf32>
    %68 = vector.shape_cast %65 : vector<8xf32> to vector<1x8xf32>
    tpu.vector_store %arg6[%c0_25, %c0_26], %68 {strides = array<i32>} : memref<1x8xf32, #tpu.memory_space<vmem>>, vector<1x8xf32>,
    return
  }
}

</mosaic_0001>

<bundles_post_ra>
// kernel: _similarity_scores_impl.1
= control target key start
LH: loop header
LB: loop body
LE: loop exit
PB: predicated region body
PF: predicated region fallthrough
CT: control target
= control target key end

     0   :  { %v2423_v1 = vmov 0   ;;  %s2738_s0 = inlined_call_operand.vmem [shape: s32[16,1], index: 0, kind: input, shape index: {}]   ;;  %s2739_s1 = inlined_call_operand.vmem [shape: s32[16,1], index: 1, kind: input, shape index: {}]   ;;  %s2740_s2 = inlined_call_operand.vmem [shape: s32[8,1], index: 2, kind: input, shape index: {}]   ;;  %s2741_s3 = inlined_call_operand.vmem [shape: s32[1,8], index: 3, kind: input, shape index: {}]   ;;  %s2742_s4 = inlined_call_operand.vmem [shape: f32[16,32], index: 4, kind: input, shape index: {}]   ;;  %s2743_s5 = inlined_call_operand.vmem [shape: f32[32,32], index: 5, kind: input, shape index: {}]   ;;  %s2744_s6 = inlined_call_operand.hbm [shape: f32[1,8], index: 6, kind: output, shape index: {}]  }
   0x1   :  { %v26_v0 = vld [vmem:[%s2738_s0] sm:$0xff]  ;;  %2381 = vset.pattern.permute.xlu0 %v2423_v1  ;;  %v55_v2 = vld [vmem:[%s2742_s4 + $0x8] sm:$0xff]  ;;  %2382 = vset.pattern.permute.xlu1 %v2423_v1 }
   0x2   :  { %v54_v3 = vld [vmem:[%s2742_s4] sm:$0xff]  ;;  %29 = vperm.xlu0 %2381, %v26_v0   ;;  %v92_v4 = vand.u32 4294901760, %v55_v2 }
   0x3   :  { %v2471_v5 = vand.u32 4294901760, %v54_v3 }
   0x4   :  { %11 = vsyncpa [#allocation3], 0  ;;  %v27_v6 = vld [vmem:[%s2738_s0 + $0x8] sm:$0xff]  ;;  %v2476_v7 = vsub.f32 %v55_v2, %v92_v4  ;;  %2209 = vmatprep.subr.mxu0 %v92_v4  ;;  %v40_v11 = vld [vmem:[%s2739_s1] sm:$0xff]  ;;  %v24_v17 = vlaneseq  ;;  %vm56_vm0 = vcmask 130048   ;;  %v2424_v20 = vmov 0.0  }
   0x5   :  { %v2479_v8 = vsub.f32 %v54_v3, %v2471_v5  ;;  %2210 = vmatpush3.msra.mxu0 %v92_v4  ;;  %v1584_v16 = vld [vmem:[%s2740_s2] sm:$0xff]  ;;  %vm569_vm3 = vcmask 261120   ;;  %v568_v2 = vld [vmem:[%s2743_s5 + $0x18] sm:$0xff]  ;;  %vm2425_vm10 = vmmov 0   ;;  %vm1595_vm11 = vcmask 64512  }
   0x6   :  { %32 = vperm.xlu0 %2381, %v27_v6   ;;  %v2482_v9 = vand.u32 4294901760, %v2476_v7  ;;  %2211 = vmatprep.subr.mxu0 %v2471_v5  ;;  %v2501_v18 = vand.u32 127, %v24_v17  ;;  %v2552_v3 = vand.u32 4294901760, %v568_v2 }
   0x7   :  { %v2485_v10 = vand.u32 4294901760, %v2479_v8  ;;  %2212 = vmatpush3.msra.mxu0 %v2471_v5 }
   0x8   :  { %v182_v12 = vsub.f32 %v2476_v7, %v2482_v9  ;;  %2223 = vmatprep.subr.mxu0 %v2476_v7  ;;  %v2559_v6 = vsub.f32 %v568_v2, %v2552_v3 }
   0x9   :  { %v189_v13 = vsub.f32 %v2479_v8, %v2485_v10 }
   0xa   :  { %43 = vperm.xlu0 %2381, %v40_v11   ;;  %v183_v14 = vand.u32 4294901760, %v182_v12  ;;  %v565_v12 = vld [vmem:[%s2743_s5] sm:$0xff] }
   0xb   :  { %v190_v15 = vand.u32 4294901760, %v189_v13 }
   0xc   :  { %2216 = vmatprep.subr.mxu1 %v183_v14 }
   0xd   :  { %2217 = vmatpush3.msra.mxu1 %v183_v14 }
   0xe   :  { %1587 = vperm.xlu0 %2381, %v1584_v16   ;;  %2218 = vmatprep.subr.mxu1 %v190_v15  ;;  %v2589_v16 = vand.u32 4294901760, %v565_v12 }
   0xf   :  { %2219 = vmatpush3.msra.mxu1 %v190_v15 }
  0x10   :  { %2230 = vmatprep.subr.mxu1 %v92_v4 }
  0x7d   :  { %v30_v19 = vpop.permute.xlu0 %29 }
  0x7e   :  { %vm34_vm1 = vcmp.eq.s32.totalorder %v2501_v18, %v30_v19 }
  0x7f   :  { %v2108_v21 = vsel %vm34_vm1, 1.0, %v2424_v20  ;;  %vm2092_vm1 = vcmask 57344  }
  0x80   :  { %v58_v22 = vsel %vm56_vm0, %v2108_v21, 0  ;;  %2220 = vmatprep.mubr.msk.f32.mxu1 %vm56_vm0, %v2108_v21 }
  0x81   :  { %v131_v23 = vsub.f32 %v58_v22, %v58_v22  ;;  %v33_v24 = vpop.permute.xlu0 %32 }
  0x82   :  { %vm35_vm2 = vcmp.eq.s32.totalorder %v2501_v18, %v33_v24 }
  0x83   :  { %v2109_v25 = vsel %vm35_vm2, 1.0, %v2424_v20  ;;  %v132_v26 = vand.u32 4294901760, %v131_v23 }
  0x84   :  { %v61_v27 = vsel %vm56_vm0, %v2109_v25, 0  ;;  %2221 = vmatmul.mubr.msk.f32.vlgmr.msra.gmra.mxu1 %vm56_vm0, %v2109_v25 }
  0x85   :  { %v141_v28 = vsub.f32 %v61_v27, %v61_v27  ;;  %v44_v29 = vpop.permute.xlu0 %43  ;;  %2234 = vmatprep.mubr.f32.mxu1 %v132_v26  ;;  %2231 = vmatpush3.msra.mxu1 %v92_v4  ;;  %v133_v30 = vsub.f32 %v131_v23, %v132_v26 }
  0x86   :  { %vm48_vm4 = vcmp.eq.s32.totalorder %v2501_v18, %v44_v29  ;;  %2232 = vmatprep.subr.mxu1 %v2471_v5 }
  0x87   :  { %v2514_v31 = vsel %vm48_vm4, 1.0, %v2424_v20  ;;  %2233 = vmatpush3.msra.mxu1 %v2471_v5  ;;  %v134_v32 = vand.u32 4294901760, %v133_v30  ;;  %v142_v33 = vand.u32 4294901760, %v141_v28  ;;  %v41_v30 = vld [vmem:[%s2739_s1 + $0x8] sm:$0xff] }
  0x88   :  { %v571_v34 = vsel %vm569_vm3, %v2514_v31, 0  ;;  %2244 = vmatprep.subr.mxu1 %v92_v4 }
  0x89   :  { %v2519_v35 = vsub.f32 %v571_v34, %v571_v34  ;;  %2213 = vmatprep.mubr.f32.mxu0 %v134_v32  ;;  %2235 = vmatmul.mubr.f32.vlgmr.msra.gmra.mxu1 %v142_v33  ;;  %v143_v36 = vsub.f32 %v141_v28, %v142_v33 }
  0x8a   :  { %2245 = vmatpush3.msra.mxu1 %v92_v4  ;;  %2248 = vmatprep.mubr.msk.f32.mxu1 %vm56_vm0, %v2108_v21 }
  0x8b   :  { %2246 = vmatprep.subr.mxu1 %v2471_v5  ;;  %v144_v37 = vand.u32 4294901760, %v143_v36  ;;  %v647_v38 = vand.u32 4294901760, %v2519_v35 }
  0x8c   :  { %2247 = vmatpush3.msra.mxu1 %v2471_v5  ;;  %v567_v5 = vld [vmem:[%s2743_s5 + $0x10] sm:$0xff] }
  0x8d   :  { %2214 = vmatmul.mubr.f32.vlgmr.msra.gmra.mxu0 %v144_v37  ;;  %2249 = vmatmul.mubr.msk.f32.vlgmr.msra.gmra.mxu1 %vm56_vm0, %v2109_v25  ;;  %v648_v39 = vsub.f32 %v2519_v35, %v647_v38 }
  0x8e   :  { %2224 = vmatpush3.msra.mxu0 %v2476_v7  ;;  %2227 = vmatprep.mubr.f32.mxu0 %v131_v23  ;;  %v2561_v7 = vand.u32 4294901760, %v567_v5  ;;  %v2599_v23 = vsub.f32 %v565_v12, %v2589_v16 }
  0x8f   :  { %2225 = vmatprep.subr.mxu0 %v2479_v8  ;;  %2270 = vmatprep.mubr.msk.f32.mxu1 %vm569_vm3, %v2514_v31  ;;  %v649_v40 = vand.u32 4294901760, %v648_v39 }
  0x90   :  { %2226 = vmatpush3.msra.mxu0 %v2479_v8  ;;  %v566_v8 = vld [vmem:[%s2743_s5 + $0x8] sm:$0xff]  ;;  %v2606_v26 = vand.u32 4294901760, %v2599_v23 }
  0x91   :  { %2237 = vmatprep.subr.mxu0 %v2482_v9  ;;  %2228 = vmatmul.mubr.f32.vlgmr.msra.gmra.mxu0 %v141_v28  ;;  %v2574_v11 = vand.u32 4294901760, %v566_v8 }
  0x92   :  { %2238 = vmatpush3.msra.mxu0 %v2482_v9  ;;  %2241 = vmatprep.mubr.msk.f32.mxu0 %vm56_vm0, %v2108_v21  ;;  %v2569_v9 = vand.u32 4294901760, %v2559_v6  ;;  %v714_v28 = vsub.f32 %v2599_v23, %v2606_v26 }
  0x93   :  { %2239 = vmatprep.subr.mxu0 %v2485_v10  ;;  %v2587_v15 = vsub.f32 %v566_v8, %v2574_v11 }
  0x94   :  { %2240 = vmatpush3.msra.mxu0 %v2485_v10  ;;  %v2572_v10 = vsub.f32 %v567_v5, %v2561_v7  ;;  %v693_v13 = vsub.f32 %v2559_v6, %v2569_v9  ;;  %v715_v29 = vand.u32 4294901760, %v714_v28 }
  0x95   :  { %2242 = vmatmul.mubr.msk.f32.vlgmr.msra.gmra.mxu0 %vm56_vm0, %v2109_v25  ;;  %2251 = vmatprep.subr.mxu0 %v2552_v3  ;;  %v2596_v22 = vand.u32 4294901760, %v2587_v15 }
  0x96   :  { %2259 = vmatprep.mubr.f32.mxu0 %v649_v40  ;;  %2252 = vmatpush3.msra.mxu0 %v2552_v3  ;;  %v2584_v14 = vand.u32 4294901760, %v2572_v10  ;;  %v694_v19 = vand.u32 4294901760, %v693_v13 }
  0x97   :  { %2253 = vmatprep.subr.mxu0 %v2561_v7  ;;  %v707_v25 = vsub.f32 %v2587_v15, %v2596_v22 }
  0x98   :  { %2254 = vmatpush3.msra.mxu0 %v2561_v7  ;;  %v700_v21 = vsub.f32 %v2572_v10, %v2584_v14  ;;  %2262 = vmatprep.subr.mxu1 %v694_v19 }
  0x99   :  { %2255 = vmatprep.subr.mxu0 %v2574_v11  ;;  %2263 = vmatpush3.msra.mxu1 %v694_v19  ;;  %v708_v27 = vand.u32 4294901760, %v707_v25 }
  0x9a   :  { %2256 = vmatpush3.msra.mxu0 %v2574_v11  ;;  %v701_v24 = vand.u32 4294901760, %v700_v21 }
  0x9b   :  { %2257 = vmatprep.subr.mxu0 %v2589_v16 }
  0x9c   :  { %2258 = vmatpush3.msra.mxu0 %v2589_v16  ;;  %2264 = vmatprep.subr.mxu1 %v701_v24 }
  0x9d   :  { %2273 = vmatprep.subr.mxu0 %v2559_v6  ;;  %2265 = vmatpush3.msra.mxu1 %v701_v24 }
  0x9e   :  { %2266 = vmatprep.subr.mxu1 %v708_v27 }
  0x9f   :  { %2267 = vmatpush3.msra.mxu1 %v708_v27 }
  0xa0   :  { %2268 = vmatprep.subr.mxu1 %v715_v29 }
  0xa1   :  { %2269 = vmatpush3.msra.mxu1 %v715_v29 }
  0xa2   :  { %2284 = vmatprep.subr.mxu1 %v2552_v3 }
 0x144   :  { %v2222_v41 = vpop.f32.mrf.mxu1 }
 0x146   :  { %v227_v42 = vpop.f32.mrf.mxu1 }
 0x149   :  { %v2236_v43 = vpop.f32.mrf.mxu1 }
 0x14b   :  { %v391_v47 = vpop.f32.mrf.mxu1 }
 0x14d   :  { %v2215_v44 = vpop.f32.mrf.mxu0  ;;  %v2250_v54 = vpop.f32.mrf.mxu1 }
 0x14e   :  { %v234_v46 = vadd.f32 %v2222_v41, %v2215_v44 }
 0x14f   :  { %v136_v45 = vpop.f32.mrf.mxu0  ;;  %v555_v61 = vpop.f32.mrf.mxu1 }
 0x150   :  { %v228_v49 = vadd.f32 %v227_v42, %v136_v45 }
 0x151   :  { %v2229_v48 = vpop.f32.mrf.mxu0 }
 0x152   :  { %v317_v50 = vadd.f32 %v2229_v48, %v234_v46 }
 0x153   :  { %v309_v51 = vpop.f32.mrf.mxu0 }
 0x154   :  { %v310_v52 = vadd.f32 %v309_v51, %v228_v49  ;;  %v400_v53 = vadd.f32 %v2236_v43, %v317_v50 }
 0x155   :  { %v2243_v55 = vpop.f32.mrf.mxu0 }
 0x156   :  { %v483_v56 = vadd.f32 %v2243_v55, %v400_v53  ;;  %v392_v57 = vadd.f32 %v391_v47, %v310_v52 }
 0x157   :  { %v476_v58 = vpop.f32.mrf.mxu0 }
 0x158   :  { %v2540_v59 = vadd.f32 %v2250_v54, %v483_v56  ;;  %v477_v60 = vadd.f32 %v476_v58, %v392_v57 }
 0x15a   :  { %v2542_v62 = vadd.f32 %v555_v61, %v477_v60  ;;  %v1118_v63 = vmul.f32 %v2540_v59, %v2540_v59 }
 0x15c   :  { %v1119_v0 = vsel %vm569_vm3, %v1118_v63, 0.0  ;;  %v1104_v1 = vmul.f32 %v2542_v62, %v2542_v62 }
 0x15d   :  { %1120 = vadd.xlane.f32.xlu1 %v1119_v0 }
 0x15e   :  { %v1105_v4 = vsel %vm569_vm3, %v1104_v1, 0.0 }
 0x161   :  { %1106 = vadd.xlane.f32.xlu1 %v1105_v4 }
 0x172   :  { %46 = vperm.xlu1 %2382, %v41_v30  }
 0x1e6   :  { %v1121_v32 = vpop.xlane.xlu1 %1120 }
 0x1e7   :  { %2383 = vrsqrt.f32 %v1121_v32  ;;  %vm1124_vm6 = vcmp.eq.f32.partialorder %v1121_v32, inf  ;;  %v1127_v43 = vand.u32 2147483648, %v1121_v32  ;;  %vm1126_vm7 = vcmp.eq.f32.partialorder %v1121_v32, 0.0 }
 0x1ea   :  { %v1107_v33 = vpop.xlane.xlu1 %1106 }
 0x1eb   :  { %2385 = vrsqrt.f32 %v1107_v33  ;;  %vm1110_vm8 = vcmp.eq.f32.partialorder %v1107_v33, inf  ;;  %v1113_v50 = vand.u32 2147483648, %v1107_v33  ;;  %vm1112_vm9 = vcmp.eq.f32.partialorder %v1107_v33, 0.0 }
 0x1ee   :  { %v47_v34 = vpop.permute.xlu1 %46 }
 0x1ef   :  { %vm49_vm5 = vcmp.eq.s32.totalorder %v2501_v18, %v47_v34 }
 0x1f0   :  { %v2617_v36 = vsel %vm49_vm5, 1.0, %v2424_v20 }
 0x1f1   :  { %v574_v37 = vsel %vm569_vm3, %v2617_v36, 0  ;;  %2271 = vmatmul.mubr.msk.f32.vlgmr.msra.gmra.mxu1 %vm569_vm3, %v2617_v36 }
 0x1f2   :  { %v656_v39 = vsub.f32 %v574_v37, %v574_v37  ;;  %2285 = vmatpush3.msra.mxu1 %v2552_v3  ;;  %2292 = vmatprep.mubr.f32.mxu1 %v647_v38 }
 0x1f3   :  { %2286 = vmatprep.subr.mxu1 %v2561_v7 }
 0x1f4   :  { %v2384_v40 = vpop.eup %2383  ;;  %2287 = vmatpush3.msra.mxu1 %v2561_v7  ;;  %v657_v41 = vand.u32 4294901760, %v656_v39 }
 0x1f5   :  { %v1123_v42 = vmul.f32 %v2384_v40, %v1121_v32  ;;  %2288 = vmatprep.subr.mxu1 %v2574_v11 }
 0x1f6   :  { %2289 = vmatpush3.msra.mxu1 %v2574_v11  ;;  %v658_v44 = vsub.f32 %v656_v39, %v657_v41 }
 0x1f7   :  { %v1125_v45 = vsel %vm1124_vm6, %v1121_v32, %v1123_v42  ;;  %2290 = vmatprep.subr.mxu1 %v2589_v16 }
 0x1f8   :  { %v2386_v46 = vpop.eup %2385  ;;  %v1128_v38 = vsel %vm1126_vm7, %v1127_v43, %v1125_v45  ;;  %2291 = vmatpush3.msra.mxu1 %v2589_v16  ;;  %v659_v47 = vand.u32 4294901760, %v658_v44 }
 0x1f9   :  { %v1129_v48 = vmax.f32 %v1128_v38, 1e-08  ;;  %v1109_v49 = vmul.f32 %v2386_v46, %v1107_v33  ;;  %2293 = vmatmul.mubr.f32.vlgmr.msra.gmra.mxu1 %v657_v41  ;;  %2306 = vmatprep.subr.mxu1 %v2552_v3 }
 0x1fa   :  { %2307 = vmatpush3.msra.mxu1 %v2552_v3  ;;  %2314 = vmatprep.mubr.msk.f32.mxu1 %vm569_vm3, %v2514_v31 }
 0x1fb   :  { %2387 = vrcp.f32 %v1129_v48  ;;  %v1111_v51 = vsel %vm1110_vm8, %v1107_v33, %v1109_v49  ;;  %2260 = vmatmul.mubr.f32.vlgmr.msra.gmra.mxu0 %v659_v47  ;;  %2308 = vmatprep.subr.mxu1 %v2561_v7  ;;  %v2124_v48 = vld [vmem:[%s2741_s3] ss:$0 sm:$0xff]  ;;  %v1588_v49 = vpop.permute.xlu0 %1587  ;;  %s2426_s3 = smov [#allocation2]  }
 0x1fc   :  { %v1114_v52 = vsel %vm1112_vm9, %v1113_v50, %v1111_v51  ;;  %2274 = vmatpush3.msra.mxu0 %v2559_v6  ;;  %2281 = vmatprep.mubr.f32.mxu0 %v2519_v35  ;;  %vm1593_vm12 = vcmp.eq.s32.totalorder %v1588_v49, %v2124_v48  ;;  %s2100_s16 = sshll.u32 %s2426_s3, 4  ;;  %s2101_s16 = int_to_ptr.vmem [resolvable:$true] %s2100_s16 }
 0x1fd   :  { %v1115_v53 = vmax.f32 %v1114_v52, 1e-08  ;;  %2275 = vmatprep.subr.mxu0 %v2572_v10  ;;  %2309 = vmatpush3.msra.mxu1 %v2561_v7  ;;  %s2401_s17 = scalar_lea.vmem %s2101_s16, 16  ;;  %s2405_s18 = scalar_lea.vmem %s2101_s16, 32 }
 0x1fe   :  { %2276 = vmatpush3.msra.mxu0 %v2572_v10  ;;  %2310 = vmatprep.subr.mxu1 %v2574_v11  ;;  %p2402_p0 = scmp.ne.s32.totalorder %s2101_s16, %s2401_s17  ;;  %p2406_p1 = scmp.lt.s32.totalorder %s2101_s16, %s2101_s16 }
 0x1ff   :  { %2389 = vrcp.f32 %v1115_v53  ;;  %2277 = vmatprep.subr.mxu0 %v2587_v15  ;;  %2311 = vmatpush3.msra.mxu1 %v2574_v11  ;;  %p2407_p2 = scmp.lt.s32.totalorder %s2405_s18, %s2401_s17 }
 0x200   :  { %2278 = vmatpush3.msra.mxu0 %v2587_v15  ;;  %2312 = vmatprep.subr.mxu1 %v2589_v16 }
 0x201   :  { %2279 = vmatprep.subr.mxu0 %v2599_v23  ;;  %2313 = vmatpush3.msra.mxu1 %v2589_v16  ;;  %p2408_p3 = por %p2407_p2, %p2406_p1 }
 0x202   :  { %2280 = vmatpush3.msra.mxu0 %v2599_v23  ;;  %2315 = vmatmul.mubr.msk.f32.vlgmr.msra.gmra.mxu1 %vm569_vm3, %v2617_v36 }
 0x203   :  { %2282 = vmatmul.mubr.f32.vlgmr.msra.gmra.mxu0 %v656_v39  ;;  %2295 = vmatprep.subr.mxu0 %v2569_v9  ;;  %p2409_p4 = pnand %p2408_p3, %p2402_p0 }
 0x204   :  { %2296 = vmatpush3.msra.mxu0 %v2569_v9  ;;  %2303 = vmatprep.mubr.msk.f32.mxu0 %vm569_vm3, %v2514_v31 }
 0x205   :  { %2297 = vmatprep.subr.mxu0 %v2584_v14  ;;  %2322 = vmatprep.subr.mxu1 %v2424_v20 }
 0x206   :  { %2298 = vmatpush3.msra.mxu0 %v2584_v14  ;;  %2324 = vmatprep.mubr.msk.f32.mxu1 %vm2425_vm10, %v2424_v20 }
 0x207   :  { %2299 = vmatprep.subr.mxu0 %v2596_v22 }
 0x208   :  { %v2388_v35 = vpop.eup %2387  ;;  %2300 = vmatpush3.msra.mxu0 %v2596_v22 }
 0x209   :  { %2301 = vmatprep.subr.mxu0 %v2606_v26  ;;  %v1131_v54 = vmul.f32 %v2388_v35, %v2540_v59 }
 0x20a   :  { %2302 = vmatpush3.msra.mxu0 %v2606_v26 }
 0x20b   :  { %2304 = vmatmul.mubr.msk.f32.vlgmr.msra.gmra.mxu0 %vm569_vm3, %v2617_v36  ;;  %2317 = vmatprep.subr.mxu0 %v2424_v20  ;;  %v1136_v31 = vsel %vm569_vm3, %v1131_v54, 0 }
 0x20c   :  { %v2390_v55 = vpop.eup %2389  ;;  %v1169_v56 = vand.u32 4294901760, %v1136_v31  ;;  %2319 = vmatprep.mubr.msk.f32.mxu0 %vm2425_vm10, %v2424_v20 }
 0x20d   :  { %v1117_v57 = vmul.f32 %v2390_v55, %v2542_v62 }
 0x20e   :  { %2318 = vmatpush3.xpose.msra.mxu0 %v1169_v56  ;;  %v1246_v58 = vsub.f32 %v1136_v31, %v1169_v56 }
 0x20f   :  { %v1133_v59 = vsel %vm569_vm3, %v1117_v57, 0  ;;  %2327 = vmatprep.subr.mxu0 %v2424_v20 }
 0x210   :  { %v1247_v60 = vand.u32 4294901760, %v1246_v58  ;;  %v1204_v61 = vand.u32 4294901760, %v1133_v59 }
 0x212   :  { %v1248_v63 = vsub.f32 %v1246_v58, %v1247_v60  ;;  %v1205_v0 = vsub.f32 %v1133_v59, %v1204_v61 }
 0x214   :  { %v1249_v1 = vand.u32 4294901760, %v1248_v63  ;;  %v1206_v2 = vand.u32 4294901760, %v1205_v0 }
 0x216   :  { %2323 = vmatpush3.xpose.msra.mxu1 %v1249_v1  ;;  %v1207_v3 = vsub.f32 %v1205_v0, %v1206_v2 }
 0x217   :  { %2332 = vmatprep.subr.mxu1 %v2424_v20 }
 0x218   :  { %v1208_v4 = vand.u32 4294901760, %v1207_v3 }
 0x219   :  { %2325 = vmatmul.mubr.f32.vlgmr.msra.gmra.mxu1 %v1204_v61 }
 0x21a   :  { %2320 = vmatmul.mubr.f32.vlgmr.msra.gmra.mxu0 %v1208_v4  ;;  %2333 = vmatpush3.xpose.msra.mxu1 %v1169_v56 }
 0x21b   :  { %2328 = vmatpush3.xpose.msra.mxu0 %v1246_v58  ;;  %2334 = vmatprep.mubr.msk.f32.mxu1 %vm2425_vm10, %v2424_v20 }
 0x21c   :  { %2329 = vmatprep.mubr.msk.f32.mxu0 %vm2425_vm10, %v2424_v20  ;;  %2337 = vmatprep.subr.mxu0 %v2424_v20 }
 0x21d   :  { %2335 = vmatmul.mubr.f32.vlgmr.msra.gmra.mxu1 %v1206_v2  ;;  %2342 = vmatprep.subr.mxu1 %v2424_v20 }
 0x21e   :  { %2330 = vmatmul.mubr.f32.vlgmr.msra.gmra.mxu0 %v1205_v0  ;;  %2343 = vmatpush3.xpose.msra.mxu1 %v1169_v56 }
 0x21f   :  { %2338 = vmatpush3.xpose.msra.mxu0 %v1247_v60  ;;  %2344 = vmatprep.mubr.msk.f32.mxu1 %vm2425_vm10, %v2424_v20 }
 0x220   :  { %2339 = vmatprep.mubr.msk.f32.mxu0 %vm2425_vm10, %v2424_v20  ;;  %2347 = vmatprep.subr.mxu0 %v2424_v20 }
 0x221   :  { %2345 = vmatmul.mubr.f32.vlgmr.msra.gmra.mxu1 %v1204_v61  ;;  %2352 = vmatprep.subr.mxu1 %v2424_v20 }
 0x222   :  { %2340 = vmatmul.mubr.f32.vlgmr.msra.gmra.mxu0 %v1204_v61  ;;  %2354 = vmatprep.mubr.msk.f32.mxu1 %vm2425_vm10, %v2424_v20 }
 0x223   :  { %2349 = vmatprep.mubr.msk.f32.mxu0 %vm2425_vm10, %v2424_v20 }
 0x2b1   :  { %v2272_v5 = vpop.f32.mrf.mxu1 }
 0x2b3   :  { %v752_v7 = vpop.f32.mrf.mxu1 }
 0x2b9   :  { %v2294_v10 = vpop.f32.mrf.mxu1 }
 0x2bb   :  { %v2261_v62 = vpop.f32.mrf.mxu0  ;;  %v922_v12 = vpop.f32.mrf.mxu1 }
 0x2bc   :  { %v759_v8 = vadd.f32 %v2272_v5, %v2261_v62 }
 0x2bd   :  { %v651_v6 = vpop.f32.mrf.mxu0 }
 0x2be   :  { %v753_v27 = vadd.f32 %v752_v7, %v651_v6 }
 0x2c2   :  { %v2316_v19 = vpop.f32.mrf.mxu1 }
 0x2c3   :  { %v2283_v9 = vpop.f32.mrf.mxu0 }
 0x2c4   :  { %v846_v11 = vadd.f32 %v2283_v9, %v759_v8  ;;  %v1094_v26 = vpop.f32.mrf.mxu1 }
 0x2c5   :  { %v838_v13 = vpop.f32.mrf.mxu0 }
 0x2c6   :  { %v931_v14 = vadd.f32 %v2294_v10, %v846_v11  ;;  %v839_v32 = vadd.f32 %v838_v13, %v753_v27 }
 0x2c8   :  { %v923_v40 = vadd.f32 %v922_v12, %v839_v32 }
 0x2cb   :  { %v2305_v15 = vpop.f32.mrf.mxu0 }
 0x2cc   :  { %v1020_v16 = vadd.f32 %v2305_v15, %v931_v14 }
 0x2cd   :  { %v1013_v28 = vpop.f32.mrf.mxu0 }
 0x2ce   :  { %v1101_v21 = vadd.f32 %v2316_v19, %v1020_v16  ;;  %v1014_v44 = vadd.f32 %v1013_v28, %v923_v40 }
 0x2d0   :  { %v2692_v22 = vand.u32 4294901760, %v1101_v21  ;;  %v2707_v52 = vadd.f32 %v1094_v26, %v1014_v44 }
 0x2d2   :  { %v2695_v23 = vsub.f32 %v1101_v21, %v2692_v22  ;;  %2348 = vmatpush3.msra.mxu0 %v2692_v22  ;;  %v2060_v55 = vmul.f32 %v2707_v52, %v2707_v52 }
 0x2d3   :  { %2357 = vmatprep.subr.mxu0 %v2424_v20 }
 0x2d4   :  { %v1719_v24 = vand.u32 4294901760, %v2695_v23  ;;  %v2061_v56 = vsel %vm569_vm3, %v2060_v55, 0.0 }
 0x2d6   :  { %v1720_v25 = vsub.f32 %v2695_v23, %v1719_v24 }
 0x2d8   :  { %v1721_v29 = vand.u32 4294901760, %v1720_v25 }
 0x2d9   :  { %v1286_v30 = vpop.f32.mrf.mxu1 }
 0x2da   :  { %2353 = vmatpush3.msra.mxu1 %v1721_v29  ;;  %v1210_v33 = vpop.f32.mrf.mxu0 }
 0x2db   :  { %v2326_v34 = vpop.f32.mrf.mxu1  ;;  %2362 = vmatprep.subr.mxu1 %v2424_v20  ;;  %v1287_v37 = vadd.f32 %v1286_v30, %v1210_v33 }
 0x2dc   :  { %v2321_v36 = vpop.f32.mrf.mxu0 }
 0x2dd   :  { %v1434_v39 = vpop.f32.mrf.mxu1 }
 0x2de   :  { %v1360_v41 = vpop.f32.mrf.mxu0 }
 0x2df   :  { %v1361_v42 = vadd.f32 %v1360_v41, %v1287_v37  ;;  %v2336_v43 = vpop.f32.mrf.mxu1 }
 0x2e0   :  { %v2331_v45 = vpop.f32.mrf.mxu0 }
 0x2e1   :  { %v1580_v46 = vpop.f32.mrf.mxu1  ;;  %v1435_v38 = vadd.f32 %v1434_v39, %v1361_v42 }
 0x2e2   :  { %v1508_v47 = vpop.f32.mrf.mxu0 }
 0x2e3   :  { %v1509_v50 = vadd.f32 %v1508_v47, %v1435_v38  ;;  %v2346_v51 = vpop.f32.mrf.mxu1  ;;  %v2088_v38 = vshrl.u32 %v24_v17, 7 }
 0x2e4   :  { %v2341_v53 = vpop.f32.mrf.mxu0 }
 0x2e5   :  { %v1581_v35 = vadd.f32 %v1580_v46, %v1509_v50  ;;  %v2089_v47 = vsub.s32 %v2501_v18, %v2088_v38 }
 0x2e7   :  { %v1594_v54 = vsel %vm1593_vm12, %v1581_v35, -1e+30 }
 0x2e8   :  { %v1596_v31 = vsel %vm1595_vm11, %v1594_v54, -inf }
 0x2e9   :  { %1597 = vmax.xlane.f32.xlu0 %v1596_v31 }
 0x2ed   :  { %2062 = vadd.xlane.f32.xlu0 %v2061_v56 }
 0x372   :  { %v1598_v57 = vpop.xlane.xlu0 %1597 }
 0x373   :  { %v1599_v58 = vsub.f32 %v1594_v54, %v1598_v57 }
 0x375   :  { %v1600_v59 = vmul.f32 1.442695, %v1599_v58 }
 0x376   :  { %v2063_v30 = vpop.xlane.xlu0 %2062 }
 0x377   :  { %2391 = vpow2.f32 %v1600_v59  ;;  %vm2066_vm13 = vcmp.eq.f32.partialorder %v2063_v30, inf  ;;  %v2069_v40 = vand.u32 2147483648, %v2063_v30  ;;  %vm2068_vm15 = vcmp.eq.f32.partialorder %v2063_v30, 0.0 }
 0x384   :  { %v2392_v60 = vpop.eup %2391 }
 0x385   :  { %v1602_v61 = vsel %vm1595_vm11, %v2392_v60, 0.0 }
 0x386   :  { %1603 = vadd.xlane.f32.xlu1 %v1602_v61 }
 0x40f   :  { %v1604_v63 = vpop.xlane.xlu1 %1603 }
 0x410   :  { %2393 = vrcp.f32 %v1604_v63 }
 0x411   :  { %2395 = vrsqrt.f32 %v2063_v30 }
 0x41d   :  { %v2394_v0 = vpop.eup %2393 }
 0x41e   :  { %v1606_v1 = vmul.f32 %v2394_v0, %v2392_v60  ;;  %v2396_v33 = vpop.eup %2395 }
 0x41f   :  { %v2065_v34 = vmul.f32 %v2396_v33, %v2063_v30 }
 0x420   :  { %v1608_v2 = vsel %vm1595_vm11, %v1606_v1, 0 }
 0x421   :  { %v1676_v3 = vand.u32 4294901760, %v1608_v2  ;;  %v2067_v37 = vsel %vm2066_vm13, %v2063_v30, %v2065_v34 }
 0x422   :  { %v2070_v43 = vsel %vm2068_vm15, %v2069_v40, %v2067_v37 }
 0x423   :  { %v1677_v4 = vsub.f32 %v1608_v2, %v1676_v3  ;;  %2355 = vmatmul.mubr.f32.vlgmr.msra.gmra.mxu1 %v1676_v3 }
 0x424   :  { %2363 = vmatpush3.msra.mxu1 %v2692_v22  ;;  %2364 = vmatprep.mubr.msk.f32.mxu1 %vm2425_vm10, %v2424_v20 }
 0x425   :  { %2372 = vmatprep.subr.mxu1 %v2424_v20  ;;  %v1678_v62 = vand.u32 4294901760, %v1677_v4 }
 0x427   :  { %2365 = vmatmul.mubr.f32.vlgmr.msra.gmra.mxu1 %v1678_v62  ;;  %v1679_v5 = vsub.f32 %v1677_v4, %v1678_v62 }
 0x428   :  { %2373 = vmatpush3.msra.mxu1 %v2692_v22  ;;  %2374 = vmatprep.mubr.msk.f32.mxu1 %vm2425_vm10, %v2424_v20 }
 0x429   :  { %v1680_v6 = vand.u32 4294901760, %v1679_v5 }
 0x42b   :  { %2350 = vmatmul.mubr.f32.vlgmr.msra.gmra.mxu0 %v1680_v6  ;;  %2375 = vmatmul.mubr.f32.vlgmr.msra.gmra.mxu1 %v1676_v3 }
 0x42c   :  { %2358 = vmatpush3.msra.mxu0 %v2695_v23  ;;  %2359 = vmatprep.mubr.msk.f32.mxu0 %vm2425_vm10, %v2424_v20 }
 0x42d   :  { %2367 = vmatprep.subr.mxu0 %v2424_v20 }
 0x42f   :  { %2360 = vmatmul.mubr.f32.vlgmr.msra.gmra.mxu0 %v1677_v4 }
 0x430   :  { %2368 = vmatpush3.msra.mxu0 %v1719_v24  ;;  %2369 = vmatprep.mubr.msk.f32.mxu0 %vm2425_vm10, %v2424_v20 }
 0x433   :  { %2370 = vmatmul.mubr.f32.vlgmr.msra.gmra.mxu0 %v1676_v3 }
 0x4e3   :  { %v1758_v7 = vpop.f32.mrf.mxu1 }
 0x4e5   :  { %v2356_v8 = vpop.f32.mrf.mxu1 }
 0x4e7   :  { %v1906_v9 = vpop.f32.mrf.mxu1 }
 0x4e9   :  { %v2366_v10 = vpop.f32.mrf.mxu1 }
 0x4eb   :  { %v1682_v11 = vpop.f32.mrf.mxu0  ;;  %v2052_v12 = vpop.f32.mrf.mxu1 }
 0x4ec   :  { %v1759_v15 = vadd.f32 %v1758_v7, %v1682_v11 }
 0x4ed   :  { %v2351_v13 = vpop.f32.mrf.mxu0  ;;  %v2376_v14 = vpop.f32.mrf.mxu1 }
 0x4ef   :  { %v1832_v16 = vpop.f32.mrf.mxu0 }
 0x4f0   :  { %v1833_v19 = vadd.f32 %v1832_v16, %v1759_v15 }
 0x4f1   :  { %v2361_v21 = vpop.f32.mrf.mxu0 }
 0x4f2   :  { %v1907_v22 = vadd.f32 %v1906_v9, %v1833_v19 }
 0x4f3   :  { %v1980_v25 = vpop.f32.mrf.mxu0 }
 0x4f4   :  { %v1981_v23 = vadd.f32 %v1980_v25, %v1907_v22 }
 0x4f5   :  { %v2371_v24 = vpop.f32.mrf.mxu0 }
 0x4f6   :  { %v2053_v26 = vadd.f32 %v2052_v12, %v1981_v23 }
 0x4f8   :  { %v2071_v27 = vmul.f32 %v2053_v26, %v2053_v26  ;;  %v2056_v28 = vmul.f32 %v2053_v26, %v2707_v52 }
 0x4fa   :  { %v2072_v20 = vsel %vm569_vm3, %v2071_v27, 0.0  ;;  %v2057_v29 = vsel %vm569_vm3, %v2056_v28, 0.0 }
 0x4fb   :  { %2073 = vadd.xlane.f32.xlu0 %v2072_v20 }
 0x4ff   :  { %2058 = vadd.xlane.f32.xlu0 %v2057_v29 }
 0x584   :  { %v2074_v32 = vpop.xlane.xlu0 %2073 }
 0x585   :  { %2397 = vrsqrt.f32 %v2074_v32  ;;  %vm2077_vm14 = vcmp.eq.f32.partialorder %v2074_v32, inf  ;;  %v2080_v41 = vand.u32 2147483648, %v2074_v32  ;;  %vm2079_vm0 = vcmp.eq.f32.partialorder %v2074_v32, 0.0 }
 0x588   :  { %v2059_v49 = vpop.xlane.xlu0 %2058 }
 0x592   :  { %v2398_v36 = vpop.eup %2397 }
 0x593   :  { %v2076_v39 = vmul.f32 %v2398_v36, %v2074_v32 }
 0x595   :  { %v2078_v42 = vsel %vm2077_vm14, %v2074_v32, %v2076_v39 }
 0x596   :  { %v2081_v44 = vsel %vm2079_vm0, %v2080_v41, %v2078_v42 }
 0x597   :  { %v2082_v45 = vmul.f32 %v2081_v44, %v2070_v43 }
 0x599   :  { %v2083_v46 = vmax.f32 %v2082_v45, 1e-08 }
 0x59b   :  { %2399 = vrcp.f32 %v2083_v46 }
 0x5a8   :  { %v2400_v48 = vpop.eup %2399 }
 0x5a9   :  { %v2085_v50 = vmul.f32 %v2400_v48, %v2059_v49 }
 0x5ab   :  { %v2090_v51 = vrot.slane %v2085_v50, %v2089_v47 }
 0x5ad   :  { %2093 = vst.msk [vmem:[#allocation2] sm:$0x1] %vm2092_vm1, %v2090_v51 }
 0x5ae   :  { %2412 = shalt.err (!%p2409_p4)
}
 0x5af   :  { %2103 = dma.vmem_to_hbm [thread:$0]  %s2101_s16, 16, %s2744_s6, [#allocation3]  }
 0x5b0   :  { %2421 = dma.done.wait [#allocation3], 16  }
 0x5b1   :  { %2422 = vsyncadd [#allocation3], 4294967280 }
 0x5b2   :  { %2107 = vsyncpa [#allocation3], 1 }

</bundles_post_ra>
